<compile_context>
chip_gen: v6e
topology: v6e:2x2x1
jax: 0.10.0
libtpu: 0.0.40
codegen_flags: <defaults>
</compile_context>

<pallas_src>
import numpy as np
import jax
import jax.numpy as jnp
from jax.experimental import pallas as pl
from jax.experimental.pallas import tpu as pltpu


# -------------------------- model-geometry constants -------------------------
_C = 16                      # conv channels
_K = 5                       # conv kernel size
_L1_IN, _P1 = 64, 30         # conv1: 64 -> 60, pool -> 30
_L2_IN, _P2 = 30, 13         # conv2: 30 -> 26, pool -> 13
_L3_IN, _P3 = 13, 4          # conv3: 13 ->  9, pool ->  4 (last position dropped)

# lane-aligned (multiple-of-128) padded half-widths per layer
_H1 = 512                    # >= 30*16 = 480
_H2 = 256                    # >= 13*16 = 208
_H3 = 128                    # >=  4*16 =  64
_N1, _N2, _N3 = _P1 * _C, _P2 * _C, _P3 * _C   # 480, 208, 64 (true widths)


# ------------------------------- fused kernel --------------------------------
def cnn1d_fused_kernel(x_ref, w1_ref, w2_ref, w3_ref, wf_ref, o_ref):
    f32, bf16 = jnp.float32, jnp.bfloat16

    # fc_in ∘ conv1 (+bias via ones column) at even|odd pool positions in ONE
    # bf16 dot; MaxPool1d(2) = elementwise max of the two lane-aligned halves.
    r1 = jnp.dot(x_ref[...], w1_ref[...], preferred_element_type=f32)   # (TB, 1024)
    m1 = jnp.maximum(r1[:, :_H1], r1[:, _H1:]).astype(bf16)             # (TB, 512)

    # conv2 + pool2 (bias + carrier folded into the padded rows of w2)
    r2 = jnp.dot(m1, w2_ref[...], preferred_element_type=f32)           # (TB, 512)
    m2 = jnp.maximum(r2[:, :_H2], r2[:, _H2:]).astype(bf16)             # (TB, 256)

    # conv3 + pool3
    r3 = jnp.dot(m2, w3_ref[...], preferred_element_type=f32)           # (TB, 256)
    m3 = jnp.maximum(r3[:, :_H3], r3[:, _H3:]).astype(bf16)             # (TB, 128)

    # fc_hidden ∘ fc_out folded into one (128, 1) weight; sigmoid via EUP.
    z = jnp.dot(m3, wf_ref[...], preferred_element_type=f32)            # (TB, 1)
    o_ref[...] = pl.reciprocal(1.0 + jnp.exp(-z), approx=True)


# ---------------------- one-time parameter preparation ------------------------
def _conv_toeplitz(w, l_in):
    """Conv1d weight (Cout, Cin, K) -> matrix M of shape (l_in*Cin, l_out*Cout)
    so that, for channel-fastest flattened activations y[b, l*Cin + i], the
    conv output (channel-fastest, no bias) is  y @ M."""
    c_out, c_in, k = w.shape
    l_out = l_in - k + 1
    m = np.zeros((l_in * c_in, l_out * c_out), np.float32)
    for l in range(l_out):
        for t in range(k):
            m[(l + t) * c_in:(l + t + 1) * c_in,
              l * c_out:(l + 1) * c_out] = w[:, :, t].T
    return m


def _split_even_odd(m, c_out, p):
    """Split Toeplitz columns (layout l*Cout + o) into even / odd positions."""
    m3 = m.reshape(m.shape[0], -1, c_out)
    even = m3[:, 0:2 * p:2, :].reshape(m.shape[0], p * c_out)
    odd = m3[:, 1:2 * p:2, :].reshape(m.shape[0], p * c_out)
    return even, odd


def prepare_params(p):
    """One-time host-side rearrangement of the PyTorch-layout parameters into
    four bf16 matrices (all K/N padded to multiples of 128, biases folded)."""
    f32 = np.float32
    w_in, b_in = np.asarray(p["w_in"], f32), np.asarray(p["b_in"], f32)
    cw1, cb1 = np.asarray(p["cw1"], f32), np.asarray(p["cb1"], f32)
    cw2, cb2 = np.asarray(p["cw2"], f32), np.asarray(p["cb2"], f32)
    cw3, cb3 = np.asarray(p["cw3"], f32), np.asarray(p["cb3"], f32)
    wh, bh = np.asarray(p["wh"], f32), np.asarray(p["bh"], f32)
    wo, bo = np.asarray(p["wo"], f32), np.asarray(p["bo"], f32)
    F = w_in.shape[1]

    # layer 1: fc_in ∘ conv1 (exactly folded), bias folded via the ones column.
    t1 = _conv_toeplitz(cw1, _L1_IN)                       # (1024, 960)
    c1e, c1o = _split_even_odd(t1, _C, _P1)                # (1024, 480) each
    a1e, a1o = w_in.T @ c1e, w_in.T @ c1o                  # (F, 480)
    d1e = b_in @ c1e + np.tile(cb1, _P1)                   # (480,)
    d1o = b_in @ c1o + np.tile(cb1, _P1)
    w1 = np.zeros((F + 1, 2 * _H1), f32)
    w1[:F, 0:_N1] = a1e
    w1[F, 0:_N1] = d1e
    w1[:F, _H1:_H1 + _N1] = a1o
    w1[F, _H1:_H1 + _N1] = d1o
    w1[F, _N1] = 1.0            # carrier "1" (even half only -> max(1,0)=1)

    # layer 2: conv bias is position-invariant within a pool pair, so adding it
    # before the max (via the carrier row, identically in both halves) is exact.
    t2 = _conv_toeplitz(cw2, _L2_IN)                       # (480, 416)
    c2e, c2o = _split_even_odd(t2, _C, _P2)                # (480, 208)
    b2 = np.tile(cb2, _P2)
    w2 = np.zeros((_H1, 2 * _H2), f32)
    w2[:_N1, 0:_N2] = c2e
    w2[_N1, 0:_N2] = b2
    w2[:_N1, _H2:_H2 + _N2] = c2o
    w2[_N1, _H2:_H2 + _N2] = b2
    w2[_N1, _N2] = 1.0          # carrier

    # layer 3
    t3 = _conv_toeplitz(cw3, _L3_IN)                       # (208, 144)
    c3e, c3o = _split_even_odd(t3, _C, _P3)                # (208, 64)
    b3 = np.tile(cb3, _P3)
    w3 = np.zeros((_H2, 2 * _H3), f32)
    w3[:_N2, 0:_N3] = c3e
    w3[_N2, 0:_N3] = b3
    w3[:_N2, _H3:_H3 + _N3] = c3o
    w3[_N2, _H3:_H3 + _N3] = b3
    w3[_N2, _N3] = 1.0          # carrier

    # fc_hidden ∘ fc_out folded.  PyTorch flattens NCL (B,16,4) as c*4 + p;
    # our m3 layout is p*16 + c, so re-index fc_hidden's weight once here.
    wh_r = wh.reshape(_C, _C, _P3).transpose(2, 1, 0).reshape(_P3 * _C, _C)
    wf64 = wh_r @ wo.T                                     # (64, 1)
    bf = float((bh @ wo.T + bo).reshape(-1)[0])
    wf = np.zeros((_H3, 1), f32)
    wf[:_N3, 0] = wf64[:, 0]
    wf[_N3, 0] = bf             # applied through the carrier "1" column of m3

    bf16 = jnp.bfloat16
    return {"w1": jnp.asarray(w1, bf16), "w2": jnp.asarray(w2, bf16),
            "w3": jnp.asarray(w3, bf16), "wf": jnp.asarray(wf, bf16)}


# ------------------------------ tiling policy ---------------------------------
def _round_up(x, m):
    return ((x + m - 1) // m) * m


def _batch_tile(batch):
    """Generation-aware batch tile: cap 512 on v5*, 1024 otherwise; on v7x force
    at least two grid steps so both TensorCores get work.  Tiles are multiples
    of 128 (batch is zero-padded to a tile multiple by the wrapper)."""
    try:
        kind = jax.devices()[0].device_kind.lower()
    except Exception:
        kind = ""
    if batch <= 128:
        return batch
    cap = 512 if "v5" in kind else 1024
    if "v7" in kind:
        cap = min(cap, max(128, _round_up(-(-batch // 2), 128)))
    return min(cap, _round_up(batch, 128))


# -------------------------------- forward -------------------------------------
def cnn1d_forward(x, prep):
    batch = x.shape[0]
    feat = x.shape[-1]
    x2 = x.reshape(batch, feat).astype(jnp.float32)                 # squeeze(1)
    # append a ones column so every bias rides inside the matmuls (bf16 MXU LHS)
    x_aug = jnp.concatenate([x2, jnp.ones((batch, 1), jnp.float32)],
                            axis=1).astype(jnp.bfloat16)            # (B, F+1)

    tb = _batch_tile(batch)
    n_tiles = -(-batch // tb)
    batch_pad = n_tiles * tb
    if batch_pad != batch:
        x_aug = jnp.pad(x_aug, ((0, batch_pad - batch), (0, 0)))    # zero rows

    weights = (prep["w1"], prep["w2"], prep["w3"], prep["wf"])

    out = pl.pallas_call(
        cnn1d_fused_kernel,
        out_shape=jax.ShapeDtypeStruct((batch_pad, 1), jnp.float32),
        grid=(n_tiles,),
        in_specs=[pl.BlockSpec((tb, feat + 1), lambda i: (i, 0))]
                 + [pl.BlockSpec(w.shape, lambda i: (0, 0)) for w in weights],
        out_specs=pl.BlockSpec((tb, 1), lambda i: (i, 0)),
        compiler_params=pltpu.CompilerParams(
            dimension_semantics=("parallel",),
            vmem_limit_bytes=48 * 1024 * 1024),
    )(x_aug, *weights)
    return out[:batch]


# ------------------------- plain-JAX reference (check) ------------------------
def reference_forward(x, p):
    B, F = x.shape[0], x.shape[-1]
    x2 = x.reshape(B, F)
    h = x2 @ p["w_in"].T + p["b_in"]
    y = h.reshape(B, 64, 16).transpose(0, 2, 1)              # NCL (B, 16, 64)

    def conv(y, w, b):
        out = jax.lax.conv_general_dilated(
            y, w, window_strides=(1,), padding="VALID",
            dimension_numbers=("NCH", "OIH", "NCH"))
        return out + b[None, :, None]

    def pool(y):
        L = y.shape[2]
        P = L // 2
        return y[:, :, : 2 * P].reshape(B, 16, P, 2).max(axis=-1)

    y = pool(conv(y, p["cw1"], p["cb1"]))
    y = pool(conv(y, p["cw2"], p["cb2"]))
    y = pool(conv(y, p["cw3"], p["cb3"]))
    flat = y.reshape(B, -1)
    h2 = flat @ p["wh"].T + p["bh"]
    z = h2 @ p["wo"].T + p["bo"]
    return jax.nn.sigmoid(z)


# ----------------------------------- main --------------------------------------
if __name__ == "__main__":
    B, F = 2, 32
    key = jax.random.PRNGKey(0)
    ks = jax.random.split(key, 13)

    params = {
        "w_in": 0.05 * jax.random.normal(ks[0], (1024, F), jnp.float32),
        "b_in": 0.05 * jax.random.normal(ks[1], (1024,), jnp.float32),
        "cw1": 0.10 * jax.random.normal(ks[2], (16, 16, 5), jnp.float32),
        "cb1": 0.05 * jax.random.normal(ks[3], (16,), jnp.float32),
        "cw2": 0.10 * jax.random.normal(ks[4], (16, 16, 5), jnp.float32),
        "cb2": 0.05 * jax.random.normal(ks[5], (16,), jnp.float32),
        "cw3": 0.10 * jax.random.normal(ks[6], (16, 16, 5), jnp.float32),
        "cb3": 0.05 * jax.random.normal(ks[7], (16,), jnp.float32),
        "wh": 0.10 * jax.random.normal(ks[8], (16, 64), jnp.float32),
        "bh": 0.05 * jax.random.normal(ks[9], (16,), jnp.float32),
        "wo": 0.10 * jax.random.normal(ks[10], (1, 16), jnp.float32),
        "bo": 0.05 * jax.random.normal(ks[11], (1,), jnp.float32),
    }
    x = jax.random.normal(ks[12], (B, 1, F), jnp.float32)

    prep = prepare_params(params)                    # one-time, off the hot path
    out = jax.block_until_ready(jax.jit(cnn1d_forward)(x, prep))

    ref = jax.block_until_ready(reference_forward(x, params))
    max_err = float(jnp.max(jnp.abs(out - ref)))
    assert out.shape == (B, 1), out.shape
    # bf16 MXU path: post-sigmoid absolute error budget is a few 1e-4; 5e-3 is a
    # comfortable correctness bound.
    assert max_err < 5e-3, f"mismatch vs reference: {max_err}"

    print("KERNEL_OK")
</pallas_src>

<mosaic_0001>
module attributes {stable_mosaic.version = 11 : i64} {
  func.func @cnn1d_fused_kernel(%arg0: i32, %arg1: memref<2x33xbf16, #tpu.memory_space<vmem>>, %arg2: memref<33x1024xbf16, #tpu.memory_space<vmem>>, %arg3: memref<512x512xbf16, #tpu.memory_space<vmem>>, %arg4: memref<256x256xbf16, #tpu.memory_space<vmem>>, %arg5: memref<128x1xbf16, #tpu.memory_space<vmem>>, %arg6: memref<2x1xf32, #tpu.memory_space<vmem>>) attributes {dimension_semantics = [#tpu.dimension_semantics<parallel>], iteration_bounds = array<i64: 1>, scalar_prefetch = 0 : i64, scratch_operands = 0 : i64, tpu.core_type = #tpu.core_type<tc>, window_params = [{transform_indices = @transform_0, window_bounds = array<i64: 2, 33>}, {pipeline_mode = #tpu.pipeline_mode<synchronous>, transform_indices = @transform_1, window_bounds = array<i64: 33, 1024>}, {pipeline_mode = #tpu.pipeline_mode<synchronous>, transform_indices = @transform_2, window_bounds = array<i64: 512, 512>}, {pipeline_mode = #tpu.pipeline_mode<synchronous>, transform_indices = @transform_3, window_bounds = array<i64: 256, 256>}, {pipeline_mode = #tpu.pipeline_mode<synchronous>, transform_indices = @transform_4, window_bounds = array<i64: 128, 1>}, {transform_indices = @transform_5, window_bounds = array<i64: 2, 1>}]} {
    %c0 = arith.constant 0 : index
    %c0_0 = arith.constant 0 : index
    %0 = vector.load %arg1[%c0, %c0_0] : memref<2x33xbf16, #tpu.memory_space<vmem>>, vector<2x33xbf16>
    %c0_1 = arith.constant 0 : index
    %c0_2 = arith.constant 0 : index
    %1 = vector.load %arg2[%c0_1, %c0_2] : memref<33x1024xbf16, #tpu.memory_space<vmem>>, vector<33x1024xbf16>
    %cst = arith.constant dense<0.000000e+00> : vector<2x1024xf32>
    %2 = tpu.matmul %0, %1, %cst {dimension_numbers = #tpu.dot_dimension_numbers<[1], [0], [0], [1], [0, 0, 1, 1], [], []>} : vector<2x33xbf16>, vector<33x1024xbf16>, vector<2x1024xf32> -> vector<2x1024xf32>
    %3 = vector.extract_strided_slice %2 {offsets = [0, 0], sizes = [2, 512], strides = [1, 1]} : vector<2x1024xf32> to vector<2x512xf32>
    %4 = vector.extract_strided_slice %2 {offsets = [0, 512], sizes = [2, 512], strides = [1, 1]} : vector<2x1024xf32> to vector<2x512xf32>
    %5 = arith.maximumf %3, %4 : vector<2x512xf32>
    %6 = arith.truncf %5 : vector<2x512xf32> to vector<2x512xbf16>
    %c0_3 = arith.constant 0 : index
    %c0_4 = arith.constant 0 : index
    %7 = vector.load %arg3[%c0_3, %c0_4] : memref<512x512xbf16, #tpu.memory_space<vmem>>, vector<512x512xbf16>
    %cst_5 = arith.constant dense<0.000000e+00> : vector<2x512xf32>
    %8 = tpu.matmul %6, %7, %cst_5 {dimension_numbers = #tpu.dot_dimension_numbers<[1], [0], [0], [1], [0, 0, 1, 1], [], []>} : vector<2x512xbf16>, vector<512x512xbf16>, vector<2x512xf32> -> vector<2x512xf32>
    %9 = vector.extract_strided_slice %8 {offsets = [0, 0], sizes = [2, 256], strides = [1, 1]} : vector<2x512xf32> to vector<2x256xf32>
    %10 = vector.extract_strided_slice %8 {offsets = [0, 256], sizes = [2, 256], strides = [1, 1]} : vector<2x512xf32> to vector<2x256xf32>
    %11 = arith.maximumf %9, %10 : vector<2x256xf32>
    %12 = arith.truncf %11 : vector<2x256xf32> to vector<2x256xbf16>
    %c0_6 = arith.constant 0 : index
    %c0_7 = arith.constant 0 : index
    %13 = vector.load %arg4[%c0_6, %c0_7] : memref<256x256xbf16, #tpu.memory_space<vmem>>, vector<256x256xbf16>
    %cst_8 = arith.constant dense<0.000000e+00> : vector<2x256xf32>
    %14 = tpu.matmul %12, %13, %cst_8 {dimension_numbers = #tpu.dot_dimension_numbers<[1], [0], [0], [1], [0, 0, 1, 1], [], []>} : vector<2x256xbf16>, vector<256x256xbf16>, vector<2x256xf32> -> vector<2x256xf32>
    %15 = vector.extract_strided_slice %14 {offsets = [0, 0], sizes = [2, 128], strides = [1, 1]} : vector<2x256xf32> to vector<2x128xf32>
    %16 = vector.extract_strided_slice %14 {offsets = [0, 128], sizes = [2, 128], strides = [1, 1]} : vector<2x256xf32> to vector<2x128xf32>
    %17 = arith.maximumf %15, %16 : vector<2x128xf32>
    %18 = arith.truncf %17 : vector<2x128xf32> to vector<2x128xbf16>
    %c0_9 = arith.constant 0 : index
    %c0_10 = arith.constant 0 : index
    %19 = vector.load %arg5[%c0_9, %c0_10] : memref<128x1xbf16, #tpu.memory_space<vmem>>, vector<128x1xbf16>
    %cst_11 = arith.constant dense<0.000000e+00> : vector<2x1xf32>
    %20 = tpu.matmul %18, %19, %cst_11 {dimension_numbers = #tpu.dot_dimension_numbers<[1], [0], [0], [1], [0, 0, 1, 1], [], []>} : vector<2x128xbf16>, vector<128x1xbf16>, vector<2x1xf32> -> vector<2x1xf32>
    %cst_12 = arith.constant 0.000000e+00 : f32
    %21 = vector.broadcast %cst_12 : f32 to vector<2x1xf32>
    %22 = arith.subf %21, %20 : vector<2x1xf32>
    %23 = math.exp %22 : vector<2x1xf32>
    %cst_13 = arith.constant 1.000000e+00 : f32
    %24 = vector.broadcast %cst_13 : f32 to vector<2x1xf32>
    %25 = arith.addf %24, %23 : vector<2x1xf32>
    %26 = tpu.reciprocal %25 {approx = true} : vector<2x1xf32> -> vector<2x1xf32>
    %c0_14 = arith.constant 0 : index
    %c0_15 = arith.constant 0 : index
    %27 = vector.load %arg6[%c0_14, %c0_15] : memref<2x1xf32, #tpu.memory_space<vmem>>, vector<2x1xf32>
    tpu.vector_store %arg6[%c0_14, %c0_15], %26 {strides = array<i32>} : memref<2x1xf32, #tpu.memory_space<vmem>>, vector<2x1xf32>,
    return
  }
  func.func @transform_0(%arg0: i32) -> (i32, i32) {
    %c0_i32 = arith.constant 0 : i32
    %c0_i32_0 = arith.constant 0 : i32
    return %arg0, %c0_i32 : i32, i32
  }
  func.func @transform_1(%arg0: i32) -> (i32, i32) {
    %c0_i32 = arith.constant 0 : i32
    %c0_i32_0 = arith.constant 0 : i32
    %c0_i32_1 = arith.constant 0 : i32
    return %c0_i32, %c0_i32_0 : i32, i32
  }
  func.func @transform_2(%arg0: i32) -> (i32, i32) {
    %c0_i32 = arith.constant 0 : i32
    %c0_i32_0 = arith.constant 0 : i32
    %c0_i32_1 = arith.constant 0 : i32
    return %c0_i32, %c0_i32_0 : i32, i32
  }
  func.func @transform_3(%arg0: i32) -> (i32, i32) {
    %c0_i32 = arith.constant 0 : i32
    %c0_i32_0 = arith.constant 0 : i32
    %c0_i32_1 = arith.constant 0 : i32
    return %c0_i32, %c0_i32_0 : i32, i32
  }
  func.func @transform_4(%arg0: i32) -> (i32, i32) {
    %c0_i32 = arith.constant 0 : i32
    %c0_i32_0 = arith.constant 0 : i32
    %c0_i32_1 = arith.constant 0 : i32
    return %c0_i32, %c0_i32_0 : i32, i32
  }
  func.func @transform_5(%arg0: i32) -> (i32, i32) {
    %c0_i32 = arith.constant 0 : i32
    %c0_i32_0 = arith.constant 0 : i32
    return %arg0, %c0_i32 : i32, i32
  }
}

</mosaic_0001>

<bundles_post_ra>
// kernel: cnn1d_forward.1
= control target key start
LH: loop header
LB: loop body
LE: loop exit
PB: predicated region body
PF: predicated region fallthrough
CT: control target
= control target key end

     0   :  { %10 = vsyncpa [#allocation3], 0  ;;  %s2349_s0 = inlined_call_operand.vmem [shape: bf16[2,33], index: 0, kind: input, shape index: {}]   ;;  %s2350_s1 = inlined_call_operand.hbm [shape: bf16[33,1024], index: 1, kind: input, shape index: {}]   ;;  %s2351_s2 = inlined_call_operand.hbm [shape: bf16[512,512], index: 2, kind: input, shape index: {}]   ;;  %s2352_s3 = inlined_call_operand.hbm [shape: bf16[256,256], index: 3, kind: input, shape index: {}]   ;;  %s2353_s4 = inlined_call_operand.vmem [shape: bf16[128,1], index: 4, kind: input, shape index: {}]   ;;  %s2354_s5 = inlined_call_operand.vmem [shape: f32[2,1], index: 5, kind: output, shape index: {}]  }
   0x1   :  { %11 = vsyncpa [#allocation5], 0  ;;  %s2235_s18 = smov [#allocation4]  }
   0x2   :  { %s31_s19 = sshll.u32 %s2235_s18, 4  ;;  %s32_s19 = int_to_ptr.vmem [resolvable:$true] %s31_s19 }
   0x3   :  { %s2179_s20 = scalar_lea.vmem %s32_s19, 16384  ;;  %p2184_p1 = scmp.lt.s32.totalorder %s32_s19, %s32_s19 }
   0x4   :  { %p2180_p0 = scmp.ne.s32.totalorder %s32_s19, %s2179_s20  ;;  %p2185_p2 = scmp.lt.s32.totalorder %s2179_s20, %s2179_s20 }
   0x6   :  { %p2186_p3 = por %p2185_p2, %p2184_p1 }
   0x8   :  { %p2187_p4 = pnand %p2186_p3, %p2180_p0 }
   0xa   :  { %2190 = shalt.err (!%p2187_p4)
}
   0xb   :  { %s2236_s21 = smov 256   ;;  %s2237_s22 = smov 16  }
   0xc   :  { %37 = dma.hbm_to_vmem [thread:$0]  %s2351_s2, 16384, %s32_s19, [#allocation5], %s2236_s21, %s2236_s21, %s2237_s22  }
   0xd   :  { %s2238_s25 = smov [#allocation2]  }
   0xe   :  { %s19_s26 = sshll.u32 %s2238_s25, 4  ;;  %s20_s26 = int_to_ptr.vmem [resolvable:$true] %s19_s26 }
   0xf   :  { %s2199_s27 = scalar_lea.vmem %s20_s26, 2560  ;;  %p2204_p6 = scmp.lt.s32.totalorder %s20_s26, %s20_s26 }
  0x10   :  { %p2200_p5 = scmp.ne.s32.totalorder %s20_s26, %s2199_s27  ;;  %p2205_p7 = scmp.lt.s32.totalorder %s2199_s27, %s2199_s27 }
  0x12   :  { %p2206_p8 = por %p2205_p7, %p2204_p6 }
  0x14   :  { %p2207_p9 = pnand %p2206_p8, %p2200_p5 }
  0x16   :  { %2210 = shalt.err (!%p2207_p9)
}
  0x17   :  { %s2239_s28 = smov 512   ;;  %s2240_s29 = smov 32  }
  0x18   :  { %25 = dma.hbm_to_vmem [thread:$0]  %s2350_s1, 2560, %s20_s26, [#allocation3], %s2239_s28, %s2239_s28, %s2240_s29  }
  0x19   :  { %s2241_s7 = smov [#allocation6]  }
  0x1a   :  { %s43_s8 = sshll.u32 %s2241_s7, 4  ;;  %s44_s8 = int_to_ptr.vmem [resolvable:$true] %s43_s8 }
  0x1b   :  { %s2219_s2 = scalar_lea.vmem %s44_s8, 4096  ;;  %p2224_p11 = scmp.lt.s32.totalorder %s44_s8, %s44_s8 }
  0x1c   :  { %p2220_p10 = scmp.ne.s32.totalorder %s44_s8, %s2219_s2  ;;  %p2225_p12 = scmp.lt.s32.totalorder %s2219_s2, %s2219_s2 }
  0x1e   :  { %p2226_p13 = por %p2225_p12, %p2224_p11 }
  0x20   :  { %p2227_p0 = pnand %p2226_p13, %p2220_p10 }
  0x22   :  { %2230 = shalt.err (!%p2227_p0)
}
  0x23   :  { %s2242_s9 = smov 128   ;;  %s2243_s10 = smov 8  }
  0x24   :  { %49 = dma.hbm_to_vmem [thread:$0]  %s2352_s3, 4096, %s44_s8, [#allocation5], %s2242_s9, %s2242_s9, %s2243_s10  }
  0x25   :  { %2231 = dma.done.wait [#allocation3], 2560  }
  0x26   :  { %2232 = vsyncadd [#allocation3], 4294964736 }
  0x27   :  { %2233 = dma.done.wait [#allocation5], 20480  }
  0x28   :  { %2234 = vsyncadd [#allocation5], 4294946816  ;;  %v2244_v0 = vmov 0   ;;  %vm187_vm0 = vcmask 1040384   ;;  %v79_v1 = vld [vmem:[#allocation2 + $0x80] sm:$0x11] }
  0x29   :  { %246 = vmatprep.mubr.bf16.mxu1 %v2244_v0  ;;  %328 = vmatprep.mubr.bf16.mxu0 %v2244_v0  ;;  %v2289_v2 = vsel %vm187_vm0, 65535, %v2244_v0  ;;  %v81_v3 = vld [vmem:[#allocation2 + $0x90] sm:$0x11]  ;;  %v71_v4 = vld [vmem:[#allocation2 + $0x40] sm:$0xff]  ;;  %v1691_v5 = vcombine.high %v79_v1, %v79_v1  ;;  %v1690_v7 = vcombine.low %v79_v1, %v79_v1  ;;  %v80_v22 = vld [vmem:[#allocation2 + $0x88] sm:$0x11] }
  0x2a   :  { %v1695_v6 = vcombine.high %v81_v3, %v81_v3  ;;  %v1694_v8 = vcombine.low %v81_v3, %v81_v3  ;;  %v75_v9 = vld [vmem:[#allocation2 + $0x60] sm:$0xff]  ;;  %v73_v10 = vld [vmem:[#allocation2 + $0x50] sm:$0xff]  ;;  %v1693_v27 = vcombine.high %v80_v22, %v80_v22  ;;  %v1692_v30 = vcombine.low %v80_v22, %v80_v22  ;;  %v72_v31 = vld [vmem:[#allocation2 + $0x48] sm:$0xff] }
  0x2b   :  { %v77_v11 = vld [vmem:[#allocation2 + $0x70] sm:$0xff]  ;;  %v1683_v12 = vcombine.high %v71_v4, %v75_v9  ;;  %v194_v14 = vand.u32 %v1691_v5, %v2289_v2  ;;  %v191_v16 = vand.u32 %v1690_v7, %v2289_v2  ;;  %v63_v18 = vld [vmem:[#allocation2] sm:$0xff]  ;;  %v1682_v23 = vcombine.low %v71_v4, %v75_v9  ;;  %v76_v34 = vld [vmem:[#allocation2 + $0x68] sm:$0xff] }
  0x2c   :  { %v1687_v13 = vcombine.high %v73_v10, %v77_v11  ;;  %v206_v15 = vand.u32 %v1695_v6, %v2289_v2  ;;  %v203_v17 = vand.u32 %v1694_v8, %v2289_v2  ;;  %v67_v19 = vld [vmem:[#allocation2 + $0x20] sm:$0xff]  ;;  %v65_v20 = vld [vmem:[#allocation2 + $0x10] sm:$0xff]  ;;  %v1686_v24 = vcombine.low %v73_v10, %v77_v11  ;;  %v64_v37 = vld [vmem:[#allocation2 + $0x8] sm:$0xff] }
  0x2d   :  { %v69_v21 = vld [vmem:[#allocation2 + $0x30] sm:$0xff]  ;;  %224 = vmatprep.subr.bf16.mxu1 %v194_v14  ;;  %v1675_v25 = vcombine.high %v63_v18, %v67_v19  ;;  %v1674_v28 = vcombine.low %v63_v18, %v67_v19  ;;  %v200_v32 = vand.u32 %v1693_v27, %v2289_v2  ;;  %v2299_v35 = vld [vmem:[%s2349_s0] sm:$0x1]  ;;  %vm183_vm1 = vcmask 269312   ;;  %v68_v38 = vld [vmem:[#allocation2 + $0x28] sm:$0xff] }
  0x2e   :  { %306 = vmatprep.subr.bf16.mxu0 %v206_v15  ;;  %225 = vmatpush1.bf16.msra.mxu1 %v191_v16  ;;  %v1679_v26 = vcombine.high %v65_v20, %v69_v21  ;;  %v1678_v29 = vcombine.low %v65_v20, %v69_v21  ;;  %v1921_v33 = vld [vmem:[#allocation4 + $0xe4] ss:$16 sps:$4 sm:$0xff]   ;;  %v197_v36 = vand.u32 %v1692_v30, %v2289_v2  ;;  %v82_v39 = vld [vmem:[#allocation2 + $0x98] sm:$0x11]  ;;  %v1919_v41 = vld [vmem:[#allocation4 + $0xe0] ss:$16 sps:$4 sm:$0xff]  }
  0x2f   :  { %307 = vmatpush1.bf16.msra.mxu0 %v203_v17  ;;  %226 = vmatprep.subr.bf16.mxu1 %v1683_v12  ;;  %v1685_v40 = vcombine.high %v72_v31, %v76_v34  ;;  %v1924_v42 = vld [vmem:[#allocation4 + $0xc4] ss:$16 sps:$4 sm:$0xff]   ;;  %v1684_v43 = vcombine.low %v72_v31, %v76_v34  ;;  %v1677_v44 = vcombine.high %v64_v37, %v68_v38  ;;  %v1922_v46 = vld [vmem:[#allocation4 + $0xc0] ss:$16 sps:$4 sm:$0xff]   ;;  %v74_v50 = vld [vmem:[#allocation2 + $0x58] sm:$0xff]  ;;  %vm2246_vm2 = vmmov 0  }
  0x30   :  { %308 = vmatprep.subr.bf16.mxu0 %v1687_v13  ;;  %v1697_v45 = vcombine.high %v82_v39, %v82_v39  ;;  %v1927_v47 = vld [vmem:[#allocation4 + $0xa4] ss:$16 sps:$4 sm:$0xff]   ;;  %v1676_v48 = vcombine.low %v64_v37, %v68_v38  ;;  %v1696_v49 = vcombine.low %v82_v39, %v82_v39  ;;  %v78_v51 = vld [vmem:[#allocation2 + $0x78] sm:$0xff]  ;;  %v1925_v53 = vld [vmem:[#allocation4 + $0xa0] ss:$16 sps:$4 sm:$0xff]   ;;  %vm1666_vm3 = vcmask 1024  }
  0x31   :  { %v1930_v54 = vld [vmem:[#allocation4 + $0x84] ss:$16 sps:$4 sm:$0xff]   ;;  %v66_v56 = vld [vmem:[#allocation2 + $0x18] sm:$0xff]  ;;  %v1689_v58 = vcombine.high %v74_v50, %v78_v51  ;;  %v1928_v59 = vld [vmem:[#allocation4 + $0x80] ss:$16 sps:$4 sm:$0xff]   ;;  %v1688_v61 = vcombine.low %v74_v50, %v78_v51 }
  0x32   :  { %227 = vmatpush1.bf16.msra.mxu1 %v1682_v23  ;;  %v212_v52 = vand.u32 %v1697_v45, %v2289_v2  ;;  %v209_v55 = vand.u32 %v1696_v49, %v2289_v2  ;;  %v70_v57 = vld [vmem:[#allocation2 + $0x38] sm:$0xff]  ;;  %v1933_v60 = vld [vmem:[#allocation4 + $0x64] ss:$16 sps:$4 sm:$0xff]   ;;  %v1931_v63 = vld [vmem:[#allocation4 + $0x60] ss:$16 sps:$4 sm:$0xff]  }
  0x33   :  { %309 = vmatpush1.bf16.msra.mxu0 %v1686_v24  ;;  %228 = vmatprep.subr.bf16.mxu1 %v1675_v25  ;;  %v1681_v62 = vcombine.high %v66_v56, %v70_v57  ;;  %v1936_v1 = vld [vmem:[#allocation4 + $0x44] ss:$16 sps:$4 sm:$0xff]   ;;  %v1680_v2 = vcombine.low %v66_v56, %v70_v57  ;;  %v1934_v3 = vld [vmem:[#allocation4 + $0x40] ss:$16 sps:$4 sm:$0xff]   ;;  %v2038_v56 = vld [vmem:[#allocation4 + $0x2ec] ss:$16 sps:$4 sm:$0xff]  }
  0x34   :  { %310 = vmatprep.subr.bf16.mxu0 %v1679_v26  ;;  %v1942_v4 = vld [vmem:[#allocation4 + $0x2e4] ss:$16 sps:$4 sm:$0xff]   ;;  %v1937_v6 = vld [vmem:[#allocation4 + $0x20] ss:$16 sps:$4 sm:$0xff]  }
  0x35   :  { %v1939_v5 = vld [vmem:[#allocation4 + $0x24] ss:$16 sps:$4 sm:$0xff]   ;;  %v1940_v7 = vld [vmem:[#allocation4 + $0x2e0] ss:$16 sps:$4 sm:$0xff]  }
  0x36   :  { %229 = vmatpush1.bf16.msra.mxu1 %v1674_v28  ;;  %v1945_v8 = vld [vmem:[#allocation4 + $0x4] ss:$16 sps:$4 sm:$0xff]   ;;  %v1943_v10 = vld [vmem:[#allocation4] ss:$16 sps:$4 sm:$0xff]  }
  0x37   :  { %311 = vmatpush1.bf16.msra.mxu0 %v1678_v29  ;;  %265 = vmatprep.subr.bf16.mxu1 %v200_v32  ;;  %v1948_v9 = vld [vmem:[#allocation4 + $0x2c4] ss:$16 sps:$4 sm:$0xff]   ;;  %v1952_v13 = vld [vmem:[#allocation4 + $0x2a0] ss:$16 sps:$4 sm:$0xff]  }
  0x38   :  { %1154 = vmatprep.subr.bf16.mxu0 %v1921_v33  ;;  %v1954_v11 = vld [vmem:[#allocation4 + $0x2a4] ss:$16 sps:$4 sm:$0xff]   ;;  %v1949_v14 = vld [vmem:[#allocation4 + $0x1e0] ss:$16 sps:$4 sm:$0xff]  }
  0x39   :  { %1698 = vmatmul.mubr.msk.bf16.vlgmr.msra.gmra.mxu1 %vm183_vm1, %v2299_v35  ;;  %v1951_v12 = vld [vmem:[#allocation4 + $0x1e4] ss:$16 sps:$4 sm:$0xff]   ;;  %v1958_v17 = vld [vmem:[#allocation4 + $0x280] ss:$16 sps:$4 sm:$0xff]  }
  0x3a   :  { %1700 = vmatmul.mubr.msk.bf16.vlgmr.msra.gmra.mxu0 %vm183_vm1, %v2299_v35  ;;  %266 = vmatpush1.bf16.msra.mxu1 %v197_v36  ;;  %v1960_v15 = vld [vmem:[#allocation4 + $0x284] ss:$16 sps:$4 sm:$0xff]   ;;  %v1955_v18 = vld [vmem:[#allocation4 + $0x1c0] ss:$16 sps:$4 sm:$0xff]  }
  0x3b   :  { %287 = vmatprep.mubr.bf16.mxu1 %v2244_v0  ;;  %267 = vmatprep.subr.bf16.mxu1 %v1685_v40  ;;  %v1957_v16 = vld [vmem:[#allocation4 + $0x1c4] ss:$16 sps:$4 sm:$0xff]   ;;  %v1964_v21 = vld [vmem:[#allocation4 + $0x260] ss:$16 sps:$4 sm:$0xff]  }
  0x3c   :  { %1155 = vmatpush1.bf16.msra.mxu0 %v1919_v41  ;;  %v1966_v19 = vld [vmem:[#allocation4 + $0x264] ss:$16 sps:$4 sm:$0xff]   ;;  %v1961_v22 = vld [vmem:[#allocation4 + $0x1a0] ss:$16 sps:$4 sm:$0xff]  }
  0x3d   :  { %1156 = vmatprep.subr.bf16.mxu0 %v1924_v42  ;;  %v1963_v20 = vld [vmem:[#allocation4 + $0x1a4] ss:$16 sps:$4 sm:$0xff]   ;;  %v1970_v25 = vld [vmem:[#allocation4 + $0x240] ss:$16 sps:$4 sm:$0xff]  }
  0x3e   :  { %268 = vmatpush1.bf16.msra.mxu1 %v1684_v43  ;;  %v1972_v23 = vld [vmem:[#allocation4 + $0x244] ss:$16 sps:$4 sm:$0xff]   ;;  %v1967_v26 = vld [vmem:[#allocation4 + $0x180] ss:$16 sps:$4 sm:$0xff]  }
  0x3f   :  { %269 = vmatprep.subr.bf16.mxu1 %v1677_v44  ;;  %v1969_v24 = vld [vmem:[#allocation4 + $0x184] ss:$16 sps:$4 sm:$0xff]   ;;  %v1976_v29 = vld [vmem:[#allocation4 + $0x220] ss:$16 sps:$4 sm:$0xff]   ;;  %v2002_v44 = vld [vmem:[#allocation4 + $0xec] ss:$16 sps:$4 sm:$0xff]  }
  0x40   :  { %1157 = vmatpush1.bf16.msra.mxu0 %v1922_v46  ;;  %v1978_v27 = vld [vmem:[#allocation4 + $0x224] ss:$16 sps:$4 sm:$0xff]   ;;  %v1973_v30 = vld [vmem:[#allocation4 + $0x160] ss:$16 sps:$4 sm:$0xff]  }
  0x41   :  { %1158 = vmatprep.subr.bf16.mxu0 %v1927_v47  ;;  %v1975_v28 = vld [vmem:[#allocation4 + $0x164] ss:$16 sps:$4 sm:$0xff]   ;;  %v1982_v33 = vld [vmem:[#allocation4 + $0x200] ss:$16 sps:$4 sm:$0xff]  }
  0x42   :  { %270 = vmatpush1.bf16.msra.mxu1 %v1676_v48  ;;  %v1984_v31 = vld [vmem:[#allocation4 + $0x204] ss:$16 sps:$4 sm:$0xff]   ;;  %v1979_v34 = vld [vmem:[#allocation4 + $0x140] ss:$16 sps:$4 sm:$0xff]  }
  0x43   :  { %347 = vmatprep.subr.bf16.mxu1 %v212_v52  ;;  %v1981_v32 = vld [vmem:[#allocation4 + $0x144] ss:$16 sps:$4 sm:$0xff]   ;;  %v1988_v37 = vld [vmem:[#allocation4 + $0x3e0] ss:$16 sps:$4 sm:$0xff]  }
  0x44   :  { %1159 = vmatpush1.bf16.msra.mxu0 %v1925_v53  ;;  %v1987_v36 = vld [vmem:[#allocation4 + $0x124] ss:$16 sps:$4 sm:$0xff]   ;;  %v1985_v38 = vld [vmem:[#allocation4 + $0x120] ss:$16 sps:$4 sm:$0xff]  }
  0x45   :  { %1160 = vmatprep.subr.bf16.mxu0 %v1930_v54  ;;  %1699 = vmatmul.mubr.msk.bf16.vlgmr.msra.gmra.mxu1 %vm183_vm1, %v2299_v35  ;;  %v1993_v39 = vld [vmem:[#allocation4 + $0x104] ss:$16 sps:$4 sm:$0xff]   ;;  %v1991_v41 = vld [vmem:[#allocation4 + $0x100] ss:$16 sps:$4 sm:$0xff]  }
  0x46   :  { %348 = vmatpush1.bf16.msra.mxu1 %v209_v55  ;;  %369 = vmatprep.mubr.bf16.mxu1 %v2244_v0  ;;  %v1946_v0 = vld [vmem:[#allocation4 + $0x2c0] ss:$16 sps:$4 sm:$0xff]   ;;  %v1996_v40 = vld [vmem:[#allocation4 + $0x3c4] ss:$16 sps:$4 sm:$0xff]  }
  0x47   :  { %349 = vmatprep.subr.bf16.mxu1 %v1689_v58  ;;  %v1994_v42 = vld [vmem:[#allocation4 + $0x3c0] ss:$16 sps:$4 sm:$0xff]   ;;  %v1999_v43 = vld [vmem:[#allocation4 + $0x3a4] ss:$16 sps:$4 sm:$0xff]  }
  0x48   :  { %1161 = vmatpush1.bf16.msra.mxu0 %v1928_v59  ;;  %v1997_v45 = vld [vmem:[#allocation4 + $0x3a0] ss:$16 sps:$4 sm:$0xff]   ;;  %v2005_v47 = vld [vmem:[#allocation4 + $0x384] ss:$16 sps:$4 sm:$0xff]  }
  0x49   :  { %1162 = vmatprep.subr.bf16.mxu0 %v1933_v60  ;;  %v2003_v46 = vld [vmem:[#allocation4 + $0x380] ss:$16 sps:$4 sm:$0xff]   ;;  %v2011_v49 = vld [vmem:[#allocation4 + $0x364] ss:$16 sps:$4 sm:$0xff]  }
  0x4a   :  { %350 = vmatpush1.bf16.msra.mxu1 %v1688_v61  ;;  %v2009_v48 = vld [vmem:[#allocation4 + $0x360] ss:$16 sps:$4 sm:$0xff]   ;;  %v2017_v51 = vld [vmem:[#allocation4 + $0x344] ss:$16 sps:$4 sm:$0xff]  }
  0x4b   :  { %351 = vmatprep.subr.bf16.mxu1 %v1681_v62  ;;  %v2015_v50 = vld [vmem:[#allocation4 + $0x340] ss:$16 sps:$4 sm:$0xff]   ;;  %v2023_v53 = vld [vmem:[#allocation4 + $0x324] ss:$16 sps:$4 sm:$0xff]  }
  0x4c   :  { %1163 = vmatpush1.bf16.msra.mxu0 %v1931_v63  ;;  %v2021_v52 = vld [vmem:[#allocation4 + $0x320] ss:$16 sps:$4 sm:$0xff]   ;;  %v2029_v54 = vld [vmem:[#allocation4 + $0x304] ss:$16 sps:$4 sm:$0xff]  }
  0x4d   :  { %1164 = vmatprep.subr.bf16.mxu0 %v1936_v1  ;;  %v2027_v55 = vld [vmem:[#allocation4 + $0x300] ss:$16 sps:$4 sm:$0xff]  }
  0x4e   :  { %352 = vmatpush1.bf16.msra.mxu1 %v1680_v2 }
  0x4f   :  { %1195 = vmatprep.subr.bf16.mxu1 %v1942_v4 }
  0x50   :  { %1165 = vmatpush1.bf16.msra.mxu0 %v1934_v3  ;;  %v2000_v3 = vld [vmem:[#allocation4 + $0xe8] ss:$16 sps:$4 sm:$0xff]  }
  0x51   :  { %1166 = vmatprep.subr.bf16.mxu0 %v1939_v5  ;;  %1701 = vmatmul.mubr.msk.bf16.vlgmr.msra.gmra.mxu1 %vm183_vm1, %v2299_v35  ;;  %v1990_v35 = vld [vmem:[#allocation4 + $0x3e4] ss:$16 sps:$4 sm:$0xff]  }
  0x52   :  { %1196 = vmatpush1.bf16.msra.mxu1 %v1940_v7 }
  0x53   :  { %1197 = vmatprep.subr.bf16.mxu1 %v1948_v9  ;;  %v2014_v9 = vld [vmem:[#allocation4 + $0xac] ss:$16 sps:$4 sm:$0xff]  }
  0x54   :  { %1167 = vmatpush1.bf16.msra.mxu0 %v1937_v6  ;;  %v2008_v6 = vld [vmem:[#allocation4 + $0xcc] ss:$16 sps:$4 sm:$0xff]  }
  0x55   :  { %1168 = vmatprep.subr.bf16.mxu0 %v1945_v8  ;;  %v2006_v8 = vld [vmem:[#allocation4 + $0xc8] ss:$16 sps:$4 sm:$0xff]  }
  0x56   :  { %1198 = vmatpush1.bf16.msra.mxu1 %v1946_v0 }
  0x57   :  { %1199 = vmatprep.subr.bf16.mxu1 %v1954_v11 }
  0x58   :  { %1169 = vmatpush1.bf16.msra.mxu0 %v1943_v10  ;;  %v2012_v10 = vld [vmem:[#allocation4 + $0xa8] ss:$16 sps:$4 sm:$0xff]  }
  0x59   :  { %1170 = vmatprep.subr.bf16.mxu0 %v1951_v12  ;;  %v2020_v12 = vld [vmem:[#allocation4 + $0x8c] ss:$16 sps:$4 sm:$0xff]  }
  0x5a   :  { %1200 = vmatpush1.bf16.msra.mxu1 %v1952_v13 }
  0x5b   :  { %1201 = vmatprep.subr.bf16.mxu1 %v1960_v15 }
  0x5c   :  { %1171 = vmatpush2.bf16.msra.mxu0 %v1949_v14  ;;  %v2018_v14 = vld [vmem:[#allocation4 + $0x88] ss:$16 sps:$4 sm:$0xff]  }
  0x5d   :  { %1172 = vmatprep.subr.bf16.mxu0 %v1957_v16  ;;  %v2026_v16 = vld [vmem:[#allocation4 + $0x6c] ss:$16 sps:$4 sm:$0xff]  }
  0x5e   :  { %1202 = vmatpush1.bf16.msra.mxu1 %v1958_v17  ;;  %v2024_v17 = vld [vmem:[#allocation4 + $0x68] ss:$16 sps:$4 sm:$0xff]  }
  0x5f   :  { %1203 = vmatprep.subr.bf16.mxu1 %v1966_v19 }
  0x60   :  { %1173 = vmatpush2.bf16.msra.mxu0 %v1955_v18  ;;  %v2032_v18 = vld [vmem:[#allocation4 + $0x4c] ss:$16 sps:$4 sm:$0xff]  }
  0x61   :  { %1174 = vmatprep.subr.bf16.mxu0 %v1963_v20  ;;  %v2030_v20 = vld [vmem:[#allocation4 + $0x48] ss:$16 sps:$4 sm:$0xff]  }
  0x62   :  { %1204 = vmatpush1.bf16.msra.mxu1 %v1964_v21 }
  0x63   :  { %1205 = vmatprep.subr.bf16.mxu1 %v1972_v23  ;;  %v2035_v23 = vld [vmem:[#allocation4 + $0x2c] ss:$16 sps:$4 sm:$0xff]  }
  0x64   :  { %1175 = vmatpush2.bf16.msra.mxu0 %v1961_v22 }
  0x65   :  { %1176 = vmatprep.subr.bf16.mxu0 %v1969_v24 }
  0x66   :  { %1206 = vmatpush1.bf16.msra.mxu1 %v1970_v25 }
  0x67   :  { %1207 = vmatprep.subr.bf16.mxu1 %v1978_v27  ;;  %v2033_v27 = vld [vmem:[#allocation4 + $0x28] ss:$16 sps:$4 sm:$0xff]  }
  0x68   :  { %1177 = vmatpush2.bf16.msra.mxu0 %v1967_v26 }
  0x69   :  { %1178 = vmatprep.subr.bf16.mxu0 %v1975_v28  ;;  %v2036_v28 = vld [vmem:[#allocation4 + $0x2e8] ss:$16 sps:$4 sm:$0xff]  }
  0x6a   :  { %1208 = vmatpush1.bf16.msra.mxu1 %v1976_v29 }
  0x6b   :  { %1209 = vmatprep.subr.bf16.mxu1 %v1984_v31  ;;  %v2041_v31 = vld [vmem:[#allocation4 + $0xc] ss:$16 sps:$4 sm:$0xff]  }
  0x6c   :  { %1179 = vmatpush2.bf16.msra.mxu0 %v1973_v30 }
  0x6d   :  { %1180 = vmatprep.subr.bf16.mxu0 %v1981_v32  ;;  %v2044_v32 = vld [vmem:[#allocation4 + $0x2cc] ss:$16 sps:$4 sm:$0xff]  }
  0x6e   :  { %1210 = vmatpush1.bf16.msra.mxu1 %v1982_v33  ;;  %v2039_v33 = vld [vmem:[#allocation4 + $0x8] ss:$16 sps:$4 sm:$0xff]  }
  0x6f   :  { %1211 = vmatprep.subr.bf16.mxu1 %v1990_v35  ;;  %v2047_v35 = vld [vmem:[#allocation4 + $0x1ec] ss:$16 sps:$4 sm:$0xff]  }
  0x70   :  { %1181 = vmatpush2.bf16.msra.mxu0 %v1979_v34  ;;  %v2042_v34 = vld [vmem:[#allocation4 + $0x2c8] ss:$16 sps:$4 sm:$0xff]  }
  0x71   :  { %1182 = vmatprep.subr.bf16.mxu0 %v1987_v36  ;;  %v2050_v36 = vld [vmem:[#allocation4 + $0x2ac] ss:$16 sps:$4 sm:$0xff]  }
  0x72   :  { %1212 = vmatpush2.bf16.msra.mxu1 %v1988_v37  ;;  %v2045_v37 = vld [vmem:[#allocation4 + $0x1e8] ss:$16 sps:$4 sm:$0xff]  }
  0x73   :  { %1213 = vmatprep.subr.bf16.mxu1 %v1996_v40  ;;  %v2056_v40 = vld [vmem:[#allocation4 + $0x28c] ss:$16 sps:$4 sm:$0xff]  }
  0x74   :  { %1183 = vmatpush2.bf16.msra.mxu0 %v1985_v38  ;;  %v2048_v38 = vld [vmem:[#allocation4 + $0x2a8] ss:$16 sps:$4 sm:$0xff]  }
  0x75   :  { %1184 = vmatprep.subr.bf16.mxu0 %v1993_v39  ;;  %v2053_v39 = vld [vmem:[#allocation4 + $0x1cc] ss:$16 sps:$4 sm:$0xff]  }
  0x76   :  { %1214 = vmatpush2.bf16.msra.mxu1 %v1994_v42  ;;  %v2054_v42 = vld [vmem:[#allocation4 + $0x288] ss:$16 sps:$4 sm:$0xff]  }
  0x77   :  { %1215 = vmatprep.subr.bf16.mxu1 %v1999_v43  ;;  %v2059_v43 = vld [vmem:[#allocation4 + $0x1ac] ss:$16 sps:$4 sm:$0xff]  }
  0x78   :  { %1185 = vmatpush2.bf16.msra.mxu0 %v1991_v41  ;;  %v2051_v41 = vld [vmem:[#allocation4 + $0x1c8] ss:$16 sps:$4 sm:$0xff]  }
  0x79   :  { %1236 = vmatprep.subr.bf16.mxu0 %v2002_v44  ;;  %v2062_v44 = vld [vmem:[#allocation4 + $0x26c] ss:$16 sps:$4 sm:$0xff]  }
  0x7a   :  { %1216 = vmatpush2.bf16.msra.mxu1 %v1997_v45  ;;  %v2057_v45 = vld [vmem:[#allocation4 + $0x1a8] ss:$16 sps:$4 sm:$0xff]  }
  0x7b   :  { %1217 = vmatprep.subr.bf16.mxu1 %v2005_v47  ;;  %v2065_v47 = vld [vmem:[#allocation4 + $0x18c] ss:$16 sps:$4 sm:$0xff]  }
  0x7e   :  { %1218 = vmatpush2.bf16.msra.mxu1 %v2003_v46  ;;  %v2060_v46 = vld [vmem:[#allocation4 + $0x268] ss:$16 sps:$4 sm:$0xff]  }
  0x7f   :  { %1219 = vmatprep.subr.bf16.mxu1 %v2011_v49  ;;  %v2063_v49 = vld [vmem:[#allocation4 + $0x188] ss:$16 sps:$4 sm:$0xff]  }
  0x82   :  { %1220 = vmatpush2.bf16.msra.mxu1 %v2009_v48  ;;  %v2068_v48 = vld [vmem:[#allocation4 + $0x24c] ss:$16 sps:$4 sm:$0xff]  }
  0x83   :  { %1221 = vmatprep.subr.bf16.mxu1 %v2017_v51  ;;  %v2071_v51 = vld [vmem:[#allocation4 + $0x16c] ss:$16 sps:$4 sm:$0xff]  }
  0x86   :  { %1222 = vmatpush2.bf16.msra.mxu1 %v2015_v50  ;;  %v2066_v50 = vld [vmem:[#allocation4 + $0x248] ss:$16 sps:$4 sm:$0xff]  }
  0x87   :  { %1223 = vmatprep.subr.bf16.mxu1 %v2023_v53  ;;  %v2069_v53 = vld [vmem:[#allocation4 + $0x168] ss:$16 sps:$4 sm:$0xff]  }
  0x8a   :  { %1224 = vmatpush2.bf16.msra.mxu1 %v2021_v52  ;;  %v2074_v52 = vld [vmem:[#allocation4 + $0x22c] ss:$16 sps:$4 sm:$0xff]  }
  0x8b   :  { %1225 = vmatprep.subr.bf16.mxu1 %v2029_v54  ;;  %v2072_v54 = vld [vmem:[#allocation4 + $0x228] ss:$16 sps:$4 sm:$0xff]  }
  0x8e   :  { %1226 = vmatpush2.bf16.msra.mxu1 %v2027_v55  ;;  %v2077_v55 = vld [vmem:[#allocation4 + $0x14c] ss:$16 sps:$4 sm:$0xff]  }
  0x8f   :  { %1277 = vmatprep.subr.bf16.mxu1 %v2038_v56  ;;  %v2080_v56 = vld [vmem:[#allocation4 + $0x20c] ss:$16 sps:$4 sm:$0xff]  }
  0xf9   :  { %v248_v57 = vpop.f32.mrf.mxu1 }
  0xfa   :  { %v330_v58 = vpop.f32.mrf.mxu0 }
  0xfb   :  { %v378_v59 = vmax.f32 %v248_v57, %v330_v58  ;;  %v250_v60 = vpop.f32.mrf.mxu1  ;;  %v2075_v57 = vld [vmem:[#allocation4 + $0x148] ss:$16 sps:$4 sm:$0xff]  }
  0xfc   :  { %v332_v61 = vpop.f32.mrf.mxu0  ;;  %v2078_v58 = vld [vmem:[#allocation4 + $0x208] ss:$16 sps:$4 sm:$0xff]  }
  0xfd   :  { %v379_v62 = vmax.f32 %v250_v60, %v332_v61  ;;  %v252_v63 = vpop.f32.mrf.mxu1  ;;  %v2314_v4 = vpack.c.bf16 %v378_v59, %v378_v59  ;;  %v2083_v59 = vld [vmem:[#allocation4 + $0x12c] ss:$16 sps:$4 sm:$0xff]   ;;  %v2081_v61 = vld [vmem:[#allocation4 + $0x128] ss:$16 sps:$4 sm:$0xff]  }
  0xfe   :  { %v334_v1 = vpop.f32.mrf.mxu0  ;;  %v2086_v60 = vld [vmem:[#allocation4 + $0x3ec] ss:$16 sps:$4 sm:$0xff]  }
  0xff   :  { %v383_v2 = vpack.c.bf16 %v379_v62, %v379_v62  ;;  %v253_v5 = vpop.f32.mrf.mxu1  ;;  %v2084_v62 = vld [vmem:[#allocation4 + $0x3e8] ss:$16 sps:$4 sm:$0xff]   ;;  %v2089_v63 = vld [vmem:[#allocation4 + $0x10c] ss:$16 sps:$4 sm:$0xff]  }
 0x100   :  { %v335_v7 = vpop.f32.mrf.mxu0  ;;  %v2092_v1 = vld [vmem:[#allocation4 + $0x3cc] ss:$16 sps:$4 sm:$0xff]  }
 0x101   :  { %1186 = vmatprep.mubr.bf16.mxu0 %v383_v2  ;;  %v2095_v5 = vld [vmem:[#allocation4 + $0x3ac] ss:$16 sps:$4 sm:$0xff]  }
 0x102   :  { %1187 = vmatmul.mubr.bf16.vlgmr.msra.gmra.mxu0 %v2314_v4  ;;  %v2098_v7 = vld [vmem:[#allocation4 + $0x38c] ss:$16 sps:$4 sm:$0xff]  }
 0x103   :  { %1237 = vmatpush1.bf16.msra.mxu0 %v2000_v3  ;;  %1268 = vmatprep.mubr.bf16.mxu0 %v383_v2  ;;  %v2087_v2 = vld [vmem:[#allocation4 + $0x108] ss:$16 sps:$4 sm:$0xff]  }
 0x104   :  { %1238 = vmatprep.subr.bf16.mxu0 %v2008_v6  ;;  %v2090_v3 = vld [vmem:[#allocation4 + $0x3c8] ss:$16 sps:$4 sm:$0xff]  }
 0x105   :  { %v289_v0 = vpop.f32.mrf.mxu1  ;;  %v2093_v6 = vld [vmem:[#allocation4 + $0x3a8] ss:$16 sps:$4 sm:$0xff]  }
 0x107   :  { %1239 = vmatpush1.bf16.msra.mxu0 %v2006_v8  ;;  %v291_v11 = vpop.f32.mrf.mxu1  ;;  %v2096_v8 = vld [vmem:[#allocation4 + $0x388] ss:$16 sps:$4 sm:$0xff]  }
 0x108   :  { %1240 = vmatprep.subr.bf16.mxu0 %v2014_v9  ;;  %v2101_v9 = vld [vmem:[#allocation4 + $0x36c] ss:$16 sps:$4 sm:$0xff]  }
 0x109   :  { %v293_v13 = vpop.f32.mrf.mxu1 }
 0x10a   :  { %v2105_v13 = vld [vmem:[#allocation4 + $0x328] ss:$16 sps:$4 sm:$0xff]  }
 0x10b   :  { %1241 = vmatpush1.bf16.msra.mxu0 %v2012_v10  ;;  %v294_v15 = vpop.f32.mrf.mxu1  ;;  %v2104_v10 = vld [vmem:[#allocation4 + $0x34c] ss:$16 sps:$4 sm:$0xff]  }
 0x10c   :  { %1242 = vmatprep.subr.bf16.mxu0 %v2020_v12  ;;  %v2107_v12 = vld [vmem:[#allocation4 + $0x32c] ss:$16 sps:$4 sm:$0xff]   ;;  %v2108_v15 = vld [vmem:[#allocation4 + $0x308] ss:$16 sps:$4 sm:$0xff]  }
 0x10f   :  { %1243 = vmatpush1.bf16.msra.mxu0 %v2018_v14  ;;  %v2110_v14 = vld [vmem:[#allocation4 + $0x30c] ss:$16 sps:$4 sm:$0xff]  }
 0x110   :  { %1244 = vmatprep.subr.bf16.mxu0 %v2026_v16  ;;  %v2113_v16 = vld [vmem:[#allocation6 + $0x74] ss:$8 sps:$4 sm:$0xff]  }
 0x111   :  { %v371_v19 = vpop.f32.mrf.mxu1 }
 0x112   :  { %v380_v21 = vmax.f32 %v289_v0, %v371_v19  ;;  %v2099_v0 = vld [vmem:[#allocation4 + $0x368] ss:$16 sps:$4 sm:$0xff]   ;;  %v2119_v19 = vld [vmem:[#allocation6 + $0x54] ss:$8 sps:$4 sm:$0xff]  }
 0x113   :  { %1245 = vmatpush1.bf16.msra.mxu0 %v2024_v17  ;;  %v373_v22 = vpop.f32.mrf.mxu1  ;;  %v2116_v17 = vld [vmem:[#allocation6 + $0x64] ss:$8 sps:$4 sm:$0xff]  }
 0x114   :  { %1246 = vmatprep.subr.bf16.mxu0 %v2032_v18  ;;  %v381_v24 = vmax.f32 %v291_v11, %v373_v22  ;;  %v2317_v29 = vpack.c.bf16 %v380_v21, %v380_v21  ;;  %v2102_v11 = vld [vmem:[#allocation4 + $0x348] ss:$16 sps:$4 sm:$0xff]   ;;  %v2122_v21 = vld [vmem:[#allocation6 + $0x44] ss:$8 sps:$4 sm:$0xff]  }
 0x115   :  { %v375_v25 = vpop.f32.mrf.mxu1  ;;  %v2114_v18 = vld [vmem:[#allocation6 + $0x60] ss:$8 sps:$4 sm:$0xff]  }
 0x116   :  { %v385_v26 = vpack.c.bf16 %v381_v24, %v381_v24  ;;  %v2120_v22 = vld [vmem:[#allocation6 + $0x40] ss:$8 sps:$4 sm:$0xff]   ;;  %v2123_v24 = vld [vmem:[#allocation6 + $0x30] ss:$8 sps:$4 sm:$0xff]   ;;  %v2128_v25 = vld [vmem:[#allocation6 + $0x24] ss:$8 sps:$4 sm:$0xff]  }
 0x117   :  { %1247 = vmatpush1.bf16.msra.mxu0 %v2030_v20  ;;  %v376_v30 = vpop.f32.mrf.mxu1  ;;  %v2117_v20 = vld [vmem:[#allocation6 + $0x50] ss:$8 sps:$4 sm:$0xff]  }
 0x118   :  { %1248 = vmatprep.subr.bf16.mxu0 %v2035_v23  ;;  %1227 = vmatprep.mubr.bf16.mxu1 %v385_v26  ;;  %v2125_v23 = vld [vmem:[#allocation6 + $0x34] ss:$8 sps:$4 sm:$0xff]   ;;  %v2132_v30 = vld [vmem:[#allocation6] ss:$8 sps:$4 sm:$0xff]  }
 0x119   :  { %1228 = vmatmul.mubr.bf16.vlgmr.msra.gmra.mxu1 %v2317_v29 }
 0x11a   :  { %1278 = vmatpush1.bf16.msra.mxu1 %v2036_v28  ;;  %1309 = vmatprep.mubr.bf16.mxu1 %v385_v26  ;;  %v2126_v26 = vld [vmem:[#allocation6 + $0x20] ss:$8 sps:$4 sm:$0xff]   ;;  %v2129_v28 = vld [vmem:[#allocation6 + $0x10] ss:$8 sps:$4 sm:$0xff]  }
 0x11b   :  { %1249 = vmatpush1.bf16.msra.mxu0 %v2033_v27  ;;  %1279 = vmatprep.subr.bf16.mxu1 %v2044_v32  ;;  %v2131_v27 = vld [vmem:[#allocation6 + $0x14] ss:$8 sps:$4 sm:$0xff]   ;;  %v2135_v32 = vld [vmem:[#allocation6 + $0xf0] ss:$8 sps:$4 sm:$0xff]  }
 0x11c   :  { %1250 = vmatprep.subr.bf16.mxu0 %v2041_v31  ;;  %v2137_v31 = vld [vmem:[#allocation6 + $0xf4] ss:$8 sps:$4 sm:$0xff]  }
 0x11e   :  { %1280 = vmatpush1.bf16.msra.mxu1 %v2042_v34  ;;  %v2138_v34 = vld [vmem:[#allocation6 + $0xe0] ss:$8 sps:$4 sm:$0xff]  }
 0x11f   :  { %1251 = vmatpush1.bf16.msra.mxu0 %v2039_v33  ;;  %1281 = vmatprep.subr.bf16.mxu1 %v2050_v36  ;;  %v2140_v33 = vld [vmem:[#allocation6 + $0xe4] ss:$8 sps:$4 sm:$0xff]   ;;  %v2141_v36 = vld [vmem:[#allocation6 + $0xd0] ss:$8 sps:$4 sm:$0xff]  }
 0x120   :  { %1252 = vmatprep.subr.bf16.mxu0 %v2047_v35  ;;  %v2143_v35 = vld [vmem:[#allocation6 + $0xd4] ss:$8 sps:$4 sm:$0xff]  }
 0x122   :  { %1282 = vmatpush1.bf16.msra.mxu1 %v2048_v38  ;;  %v2144_v38 = vld [vmem:[#allocation6 + $0xc0] ss:$8 sps:$4 sm:$0xff]  }
 0x123   :  { %1253 = vmatpush2.bf16.msra.mxu0 %v2045_v37  ;;  %1283 = vmatprep.subr.bf16.mxu1 %v2056_v40  ;;  %v2146_v37 = vld [vmem:[#allocation6 + $0xc4] ss:$8 sps:$4 sm:$0xff]   ;;  %v2147_v40 = vld [vmem:[#allocation6 + $0xb0] ss:$8 sps:$4 sm:$0xff]  }
 0x124   :  { %1254 = vmatprep.subr.bf16.mxu0 %v2053_v39  ;;  %v2149_v39 = vld [vmem:[#allocation6 + $0xb4] ss:$8 sps:$4 sm:$0xff]  }
 0x126   :  { %1284 = vmatpush1.bf16.msra.mxu1 %v2054_v42  ;;  %v2150_v42 = vld [vmem:[#allocation6 + $0xa0] ss:$8 sps:$4 sm:$0xff]  }
 0x127   :  { %1255 = vmatpush2.bf16.msra.mxu0 %v2051_v41  ;;  %1285 = vmatprep.subr.bf16.mxu1 %v2062_v44  ;;  %v2152_v41 = vld [vmem:[#allocation6 + $0xa4] ss:$8 sps:$4 sm:$0xff]   ;;  %v2153_v44 = vld [vmem:[#allocation6 + $0x90] ss:$8 sps:$4 sm:$0xff]  }
 0x128   :  { %1256 = vmatprep.subr.bf16.mxu0 %v2059_v43  ;;  %v2155_v43 = vld [vmem:[#allocation6 + $0x94] ss:$8 sps:$4 sm:$0xff]  }
 0x12a   :  { %1286 = vmatpush1.bf16.msra.mxu1 %v2060_v46  ;;  %v2156_v46 = vld [vmem:[#allocation6 + $0x80] ss:$8 sps:$4 sm:$0xff]  }
 0x12b   :  { %1257 = vmatpush2.bf16.msra.mxu0 %v2057_v45  ;;  %1287 = vmatprep.subr.bf16.mxu1 %v2068_v48  ;;  %v2158_v45 = vld [vmem:[#allocation6 + $0x84] ss:$8 sps:$4 sm:$0xff]   ;;  %v2245_v48 = vmov 0.0  }
 0x12c   :  { %1258 = vmatprep.subr.bf16.mxu0 %v2065_v47  ;;  %v2159_v47 = vld [vmem:[%s2353_s4 + $0x38] sm:$0xff]  }
 0x12e   :  { %1288 = vmatpush1.bf16.msra.mxu1 %v2066_v50  ;;  %v2161_v50 = vld [vmem:[%s2353_s4 + $0x28] sm:$0xff]  }
 0x12f   :  { %1259 = vmatpush2.bf16.msra.mxu0 %v2063_v49  ;;  %1289 = vmatprep.subr.bf16.mxu1 %v2074_v52  ;;  %v2160_v49 = vld [vmem:[%s2353_s4 + $0x30] sm:$0xff]   ;;  %v2163_v52 = vld [vmem:[%s2353_s4 + $0x18] sm:$0xff]  }
 0x130   :  { %1260 = vmatprep.subr.bf16.mxu0 %v2071_v51  ;;  %v2162_v51 = vld [vmem:[%s2353_s4 + $0x20] sm:$0xff]  }
 0x132   :  { %1290 = vmatpush1.bf16.msra.mxu1 %v2072_v54 }
 0x133   :  { %1261 = vmatpush2.bf16.msra.mxu0 %v2069_v53  ;;  %1291 = vmatprep.subr.bf16.mxu1 %v2080_v56  ;;  %v2164_v53 = vld [vmem:[%s2353_s4 + $0x10] sm:$0xff]  }
 0x134   :  { %1262 = vmatprep.subr.bf16.mxu0 %v2077_v55 }
 0x136   :  { %1292 = vmatpush1.bf16.msra.mxu1 %v2078_v58 }
 0x137   :  { %1263 = vmatpush2.bf16.msra.mxu0 %v2075_v57  ;;  %1293 = vmatprep.subr.bf16.mxu1 %v2086_v60 }
 0x138   :  { %1264 = vmatprep.subr.bf16.mxu0 %v2083_v59 }
 0x13a   :  { %1294 = vmatpush2.bf16.msra.mxu1 %v2084_v62 }
 0x13b   :  { %1265 = vmatpush2.bf16.msra.mxu0 %v2081_v61  ;;  %1295 = vmatprep.subr.bf16.mxu1 %v2092_v1 }
 0x13c   :  { %1266 = vmatprep.subr.bf16.mxu0 %v2089_v63 }
 0x13e   :  { %1296 = vmatpush2.bf16.msra.mxu1 %v2090_v3 }
 0x13f   :  { %1267 = vmatpush2.bf16.msra.mxu0 %v2087_v2  ;;  %1297 = vmatprep.subr.bf16.mxu1 %v2095_v5 }
 0x140   :  { %1514 = vmatprep.subr.bf16.mxu0 %v2113_v16 }
 0x142   :  { %1269 = vmatmul.mubr.bf16.vlgmr.msra.gmra.mxu0 %v2314_v4  ;;  %1298 = vmatpush2.bf16.msra.mxu1 %v2093_v6  ;;  %v2111_v4 = vld [vmem:[#allocation6 + $0x70] ss:$8 sps:$4 sm:$0xff]  }
 0x143   :  { %1299 = vmatprep.subr.bf16.mxu1 %v2098_v7  ;;  %1515 = vmatpush1.bf16.msra.mxu0 %v2111_v4  ;;  %v2166_v4 = vld [vmem:[%s2353_s4] sm:$0xff]  }
 0x144   :  { %1516 = vmatprep.subr.bf16.mxu0 %v2116_v17 }
 0x146   :  { %1300 = vmatpush2.bf16.msra.mxu1 %v2096_v8 }
 0x147   :  { %1301 = vmatprep.subr.bf16.mxu1 %v2101_v9  ;;  %1517 = vmatpush1.bf16.msra.mxu0 %v2114_v18 }
 0x148   :  { %1518 = vmatprep.subr.bf16.mxu0 %v2119_v19 }
 0x14a   :  { %1302 = vmatpush2.bf16.msra.mxu1 %v2099_v0 }
 0x14b   :  { %1303 = vmatprep.subr.bf16.mxu1 %v2104_v10  ;;  %1519 = vmatpush1.bf16.msra.mxu0 %v2117_v20 }
 0x14c   :  { %1520 = vmatprep.subr.bf16.mxu0 %v2122_v21 }
 0x14e   :  { %1304 = vmatpush2.bf16.msra.mxu1 %v2102_v11 }
 0x14f   :  { %1305 = vmatprep.subr.bf16.mxu1 %v2107_v12  ;;  %1521 = vmatpush1.bf16.msra.mxu0 %v2120_v22 }
 0x150   :  { %1522 = vmatprep.subr.bf16.mxu0 %v2125_v23 }
 0x152   :  { %1306 = vmatpush2.bf16.msra.mxu1 %v2105_v13 }
 0x153   :  { %1307 = vmatprep.subr.bf16.mxu1 %v2110_v14  ;;  %1523 = vmatpush1.bf16.msra.mxu0 %v2123_v24 }
 0x154   :  { %1524 = vmatprep.subr.bf16.mxu0 %v2128_v25 }
 0x156   :  { %1308 = vmatpush2.bf16.msra.mxu1 %v2108_v15  ;;  %v2165_v15 = vld [vmem:[%s2353_s4 + $0x8] sm:$0xff]  }
 0x157   :  { %1525 = vmatpush1.bf16.msra.mxu0 %v2126_v26  ;;  %1879 = vmatprep.subr.bf16.mxu1 %v2245_v48 }
 0x158   :  { %1526 = vmatprep.subr.bf16.mxu0 %v2131_v27 }
 0x159   :  { %1310 = vmatmul.mubr.bf16.vlgmr.msra.gmra.mxu1 %v2317_v29  ;;  %v2134_v29 = vld [vmem:[#allocation6 + $0x4] ss:$8 sps:$4 sm:$0xff]  }
 0x15a   :  { %1880 = vmatpush3.bf16.msra.mxu1 %v2159_v47  ;;  %1895 = vmatprep.mubr.msk.bf16.mxu1 %vm2246_vm2, %v2245_v48 }
 0x15b   :  { %1527 = vmatpush1.bf16.msra.mxu0 %v2129_v28  ;;  %1881 = vmatprep.subr.bf16.mxu1 %v2245_v48 }
 0x15c   :  { %1528 = vmatprep.subr.bf16.mxu0 %v2134_v29 }
 0x15e   :  { %1882 = vmatpush3.bf16.msra.mxu1 %v2160_v49 }
 0x15f   :  { %1529 = vmatpush1.bf16.msra.mxu0 %v2132_v30  ;;  %1883 = vmatprep.subr.bf16.mxu1 %v2245_v48 }
 0x160   :  { %1530 = vmatprep.subr.bf16.mxu0 %v2137_v31 }
 0x162   :  { %1884 = vmatpush3.bf16.msra.mxu1 %v2161_v50 }
 0x163   :  { %1531 = vmatpush2.bf16.msra.mxu0 %v2135_v32  ;;  %1885 = vmatprep.subr.bf16.mxu1 %v2245_v48 }
 0x164   :  { %1532 = vmatprep.subr.bf16.mxu0 %v2140_v33 }
 0x166   :  { %1886 = vmatpush3.bf16.msra.mxu1 %v2162_v51 }
 0x167   :  { %1533 = vmatpush2.bf16.msra.mxu0 %v2138_v34  ;;  %1887 = vmatprep.subr.bf16.mxu1 %v2245_v48 }
 0x168   :  { %1534 = vmatprep.subr.bf16.mxu0 %v2143_v35 }
 0x16a   :  { %1888 = vmatpush3.bf16.msra.mxu1 %v2163_v52 }
 0x16b   :  { %1535 = vmatpush2.bf16.msra.mxu0 %v2141_v36  ;;  %1889 = vmatprep.subr.bf16.mxu1 %v2245_v48 }
 0x16c   :  { %1536 = vmatprep.subr.bf16.mxu0 %v2146_v37 }
 0x16e   :  { %1890 = vmatpush3.bf16.msra.mxu1 %v2164_v53 }
 0x16f   :  { %1537 = vmatpush2.bf16.msra.mxu0 %v2144_v38  ;;  %1891 = vmatprep.subr.bf16.mxu1 %v2245_v48 }
 0x170   :  { %1538 = vmatprep.subr.bf16.mxu0 %v2149_v39 }
 0x172   :  { %1892 = vmatpush3.bf16.msra.mxu1 %v2165_v15 }
 0x173   :  { %1539 = vmatpush2.bf16.msra.mxu0 %v2147_v40  ;;  %1893 = vmatprep.subr.bf16.mxu1 %v2245_v48 }
 0x174   :  { %1540 = vmatprep.subr.bf16.mxu0 %v2152_v41 }
 0x176   :  { %1894 = vmatpush3.bf16.msra.mxu1 %v2166_v4 }
 0x177   :  { %1541 = vmatpush2.bf16.msra.mxu0 %v2150_v42 }
 0x178   :  { %1542 = vmatprep.subr.bf16.mxu0 %v2155_v43 }
 0x17b   :  { %1543 = vmatpush2.bf16.msra.mxu0 %v2153_v44 }
 0x17c   :  { %1544 = vmatprep.subr.bf16.mxu0 %v2158_v45 }
 0x17f   :  { %1545 = vmatpush2.bf16.msra.mxu0 %v2156_v46 }
 0x1c2   :  { %v1188_v54 = vpop.f32.mrf.mxu0 }
 0x1c4   :  { %v1190_v55 = vpop.f32.mrf.mxu0 }
 0x1c6   :  { %v1192_v56 = vpop.f32.mrf.mxu0 }
 0x1c8   :  { %v1193_v57 = vpop.f32.mrf.mxu0 }
 0x1d9   :  { %v1229_v58 = vpop.f32.mrf.mxu1 }
 0x1da   :  { %v1230_v59 = vadd.f32 %v1229_v58, %v1188_v54 }
 0x1db   :  { %v1231_v60 = vpop.f32.mrf.mxu1 }
 0x1dc   :  { %v1232_v61 = vadd.f32 %v1231_v60, %v1190_v55 }
 0x1dd   :  { %v1233_v62 = vpop.f32.mrf.mxu1 }
 0x1df   :  { %v1234_v63 = vpop.f32.mrf.mxu1 }
 0x202   :  { %v1270_v1 = vpop.f32.mrf.mxu0 }
 0x204   :  { %v1272_v2 = vpop.f32.mrf.mxu0 }
 0x206   :  { %v1274_v3 = vpop.f32.mrf.mxu0 }
 0x208   :  { %v1275_v5 = vpop.f32.mrf.mxu0 }
 0x219   :  { %v1311_v6 = vpop.f32.mrf.mxu1 }
 0x21a   :  { %v1312_v7 = vadd.f32 %v1311_v6, %v1270_v1 }
 0x21b   :  { %v1313_v8 = vpop.f32.mrf.mxu1 }
 0x21c   :  { %v1314_v9 = vadd.f32 %v1313_v8, %v1272_v2  ;;  %v1318_v0 = vmax.f32 %v1230_v59, %v1312_v7 }
 0x21d   :  { %v1315_v10 = vpop.f32.mrf.mxu1 }
 0x21e   :  { %v1319_v11 = vmax.f32 %v1232_v61, %v1314_v9  ;;  %v1320_v14 = vpack.c.bf16 %v1318_v0, %v1318_v0 }
 0x21f   :  { %v1316_v12 = vpop.f32.mrf.mxu1 }
 0x220   :  { %v1321_v13 = vpack.c.bf16 %v1319_v11, %v1319_v11 }
 0x222   :  { %1546 = vmatprep.mubr.bf16.mxu0 %v1321_v13 }
 0x223   :  { %1547 = vmatmul.mubr.bf16.vlgmr.msra.gmra.mxu0 %v1320_v14 }
 0x2e3   :  { %v1548_v16 = vpop.f32.mrf.mxu0 }
 0x2e5   :  { %v1550_v17 = vpop.f32.mrf.mxu0 }
 0x2e6   :  { %v1555_v18 = vmax.f32 %v1548_v16, %v1550_v17 }
 0x2e7   :  { %v1552_v19 = vpop.f32.mrf.mxu0 }
 0x2e8   :  { %v1556_v20 = vpack.c.bf16 %v1555_v18, %v1555_v18 }
 0x2e9   :  { %v1553_v21 = vpop.f32.mrf.mxu0 }
 0x2ea   :  { %1896 = vmatmul.mubr.bf16.vlgmr.msra.gmra.mxu1 %v1556_v20 }
 0x3aa   :  { %v1655_v22 = vpop.f32.mrf.mxu1 }
 0x3ab   :  { %v1661_v23 = vsub.f32 0.0, %v1655_v22 }
 0x3ac   :  { %v1897_v24 = vpop.f32.mrf.mxu1 }
 0x3ad   :  { %v1662_v25 = vmul.f32 1.442695, %v1661_v23 }
 0x3ae   :  { %v1658_v26 = vpop.f32.mrf.mxu1 }
 0x3af   :  { %2167 = vpow2.f32 %v1662_v25 }
 0x3b0   :  { %v1898_v27 = vpop.f32.mrf.mxu1 }
 0x3bc   :  { %v2168_v28 = vpop.eup %2167 }
 0x3bd   :  { %v1664_v29 = vadd.f32 1.0, %v2168_v28 }
 0x3bf   :  { %2169 = vrcp.f32 %v1664_v29 }
 0x3cc   :  { %v2170_v30 = vpop.eup %2169 }
 0x3cd   :  { %1667 = vst.msk [vmem:[%s2354_s5] sm:$0x3] %vm1666_vm3, %v2170_v30 }
 0x3ce   :  { %1672 = vsyncpa [#allocation3], 1 }
 0x3cf   :  { %1673 = vsyncpa [#allocation5], 1 }

</bundles_post_ra>
